<compile_context>
chip_gen: v7x
topology: tpu7x:2x2x1
jax: 0.10.0
libtpu: 0.0.40
codegen_flags: <defaults>
</compile_context>

<pallas_src>
import functools

import jax
import jax.numpy as jnp
from jax.experimental import pallas as pl
from jax.experimental.pallas import tpu as pltpu

NEG_SLOPE = 0.01          # nn.LeakyReLU default
BN_EPS = 1e-5
LANE = 128
MAX_BATCH_TILE = 4096     # fits v5e's 16 MiB scoped-VMEM default with double buffering
MIN_SPLIT_BATCH = 1024    # above this, force >=2 grid steps so v7x's 2nd TC gets work
MIN_PALLAS_BATCH = 512    # below this, a plain XLA dot chain beats pallas_call overhead


def _leaky_relu(x):
    return jnp.where(x >= 0, x, NEG_SLOPE * x)


def _round_up(n, m):
    return ((n + m - 1) // m) * m


def _cdiv(a, b):
    return (a + b - 1) // b


# ----------------------------------------------------------------------------
# Kernel
# ----------------------------------------------------------------------------

def mtl_kernel(x_ref, w1_ref, c1_ref, w2_ref, c2_ref, wh_ref, bh_ref, o_ref):
    # Layer 1: input-BN + Linear1 bias + bn1 folded into (w1', c1).
    # bf16 operands on the MXU, f32 accumulation; bias add / LeakyReLU in f32.
    h = jnp.dot(x_ref[...], w1_ref[...],
                preferred_element_type=jnp.float32) + c1_ref[...]
    h = _leaky_relu(h)
    # dropout: identity in eval mode

    # Layer 2: Linear2 bias + bn2 folded into (w2', c2).
    h = jnp.dot(h.astype(jnp.bfloat16), w2_ref[...],
                preferred_element_type=jnp.float32) + c2_ref[...]
    h = _leaky_relu(h)
    # dropout: identity in eval mode

    # Fused task heads (attack | risk | zero-pad): one lane-dense 128-wide store.
    o_ref[...] = (jnp.dot(h.astype(jnp.bfloat16), wh_ref[...],
                          preferred_element_type=jnp.float32)
                  + bh_ref[...]).astype(o_ref.dtype)


def _batch_tile(B):
    tb = min(B, MAX_BATCH_TILE)
    if B >= MIN_SPLIT_BATCH:
        # Guarantee at least 2 grid steps so the "parallel" batch axis can be
        # sharded across v7x's two TensorCores (negligible cost on 1-TC chips).
        tb = min(tb, _round_up(_cdiv(B, 2), 8))
    return tb


def _pallas_forward(x, params):
    B, F = x.shape
    H1P = params["w1"].shape[1]
    H2P = params["w2"].shape[1]
    NP = params["wh"].shape[1]   # padded fused-head width (multiple of 128)

    TB = _batch_tile(B)
    grid = (_cdiv(B, TB),)

    resident = lambda shape: pl.BlockSpec(shape, lambda i: (0, 0))

    return pl.pallas_call(
        mtl_kernel,
        out_shape=jax.ShapeDtypeStruct((B, NP), jnp.bfloat16),
        grid=grid,
        in_specs=[
            pl.BlockSpec((TB, F), lambda i: (i, 0)),   # x: blocked on batch
            resident((F, H1P)),                         # w1' (bf16)
            resident((1, H1P)),                         # c1  (f32)
            resident((H1P, H2P)),                       # w2' (bf16)
            resident((1, H2P)),                         # c2  (f32)
            resident((H2P, NP)),                        # fused+padded head weight (bf16)
            resident((1, NP)),                          # fused+padded head bias   (f32)
        ],
        out_specs=pl.BlockSpec((TB, NP), lambda i: (i, 0)),
        compiler_params=pltpu.CompilerParams(
            dimension_semantics=("parallel",),
            vmem_limit_bytes=32 * 1024 * 1024),
    )(x.astype(jnp.bfloat16), params["w1"], params["c1"], params["w2"],
      params["c2"], params["wh"], params["bh"])


def _xla_forward(x, params):
    # Tiny-batch fallback: same math / dtypes as the kernel, plain XLA dot chain.
    h = _leaky_relu(jnp.dot(x.astype(jnp.bfloat16), params["w1"],
                            preferred_element_type=jnp.float32) + params["c1"])
    h = _leaky_relu(jnp.dot(h.astype(jnp.bfloat16), params["w2"],
                            preferred_element_type=jnp.float32) + params["c2"])
    out = jnp.dot(h.astype(jnp.bfloat16), params["wh"],
                  preferred_element_type=jnp.float32) + params["bh"]
    return out.astype(jnp.bfloat16)


@functools.partial(jax.jit, static_argnames=("n_attack", "n_risk", "force_pallas"))
def enhanced_multitask_forward(x, params, *, n_attack, n_risk, force_pallas=False):
    """x: (B, input_size) float32.  params: dict of folded kernel parameters."""
    B = x.shape[0]
    if force_pallas or B >= MIN_PALLAS_BATCH:
        out_pad = _pallas_forward(x, params)
    else:
        out_pad = _xla_forward(x, params)
    out = out_pad.astype(jnp.float32)
    # risk slice is lane-unaligned; kept so the write-bound slab stays at 128 lanes.
    return out[:, :n_attack], out[:, n_attack:n_attack + n_risk]


# ----------------------------------------------------------------------------
# Parameter construction / folding (host side, done once)
# ----------------------------------------------------------------------------

def fold_bn(gamma, beta, running_mean, running_var, eps=BN_EPS):
    scale = gamma / jnp.sqrt(running_var + eps)
    shift = beta - running_mean * scale
    return scale, shift


def make_raw_params(key, input_size, hidden1, hidden2, n_attack, n_risk):
    """PyTorch-style raw parameters (Linear weights are (out, in))."""
    ks = jax.random.split(key, 14)
    f32 = jnp.float32

    def lin(kw, kb, fan_in, fan_out):
        bound = 1.0 / jnp.sqrt(f32(fan_in))
        w = jax.random.uniform(kw, (fan_out, fan_in), f32, -bound, bound)
        b = jax.random.uniform(kb, (fan_out,), f32, -bound, bound)
        return w, b

    def bn(kg, kb, n):
        gamma = 1.0 + 0.1 * jax.random.normal(kg, (n,), f32)
        beta = 0.1 * jax.random.normal(kb, (n,), f32)
        rmean = 0.05 * jax.random.normal(jax.random.fold_in(kg, 1), (n,), f32)
        rvar = 1.0 + 0.1 * jax.random.uniform(jax.random.fold_in(kb, 1), (n,), f32)
        return gamma, beta, rmean, rvar

    w1, b1 = lin(ks[0], ks[1], input_size, hidden1)
    w2, b2 = lin(ks[2], ks[3], hidden1, hidden2)
    wa, ba = lin(ks[4], ks[5], hidden2, n_attack)
    wr, br = lin(ks[6], ks[7], hidden2, n_risk)
    g0, be0, m0, v0 = bn(ks[8], ks[9], input_size)
    g1, be1, m1, v1 = bn(ks[10], ks[11], hidden1)
    g2, be2, m2, v2 = bn(ks[12], ks[13], hidden2)

    return dict(w1=w1, b1=b1, w2=w2, b2=b2, wa=wa, ba=ba, wr=wr, br=br,
                g0=g0, be0=be0, m0=m0, v0=v0,
                g1=g1, be1=be1, m1=m1, v1=v1,
                g2=g2, be2=be2, m2=m2, v2=v2)


def fold_params(raw):
    """Fold BN affines + Linear biases into weights/bias rows, fuse + pad heads,
    pad hidden dims to 128 lanes, cast matmul operands to bf16."""
    s0, t0 = fold_bn(raw["g0"], raw["be0"], raw["m0"], raw["v0"])
    s1, t1 = fold_bn(raw["g1"], raw["be1"], raw["m1"], raw["v1"])
    s2, t2 = fold_bn(raw["g2"], raw["be2"], raw["m2"], raw["v2"])

    w1 = raw["w1"].T  # (in, h1)
    w2 = raw["w2"].T  # (h1, h2)

    # layer 1: bn1( bn0(x) @ W1 + b1 ) = x @ W1' + c1
    w1f = (s0[:, None] * w1) * s1[None, :]
    c1 = ((t0 @ w1) + raw["b1"]) * s1 + t1

    # layer 2: bn2( h @ W2 + b2 ) = h @ W2' + c2
    w2f = w2 * s2[None, :]
    c2 = raw["b2"] * s2 + t2

    # fused heads: (attack | risk), padded to a 128-lane output slab
    n_attack = raw["wa"].shape[0]
    n_risk = raw["wr"].shape[0]
    n_head = n_attack + n_risk
    n_pad = _round_up(n_head, LANE)
    wh = jnp.concatenate([raw["wa"].T, raw["wr"].T], axis=1)     # (h2, n_head)
    bh = jnp.concatenate([raw["ba"], raw["br"]], axis=0)         # (n_head,)

    # lane-pad hidden dims (padded cols stay exactly 0 through LeakyReLU)
    H1, H2 = w1f.shape[1], w2f.shape[1]
    H1P, H2P = _round_up(H1, LANE), _round_up(H2, LANE)
    w1f = jnp.pad(w1f, ((0, 0), (0, H1P - H1)))
    c1 = jnp.pad(c1, (0, H1P - H1))
    w2f = jnp.pad(w2f, ((0, H1P - H1), (0, H2P - H2)))
    c2 = jnp.pad(c2, (0, H2P - H2))
    wh = jnp.pad(wh, ((0, H2P - H2), (0, n_pad - n_head)))
    bh = jnp.pad(bh, (0, n_pad - n_head))

    row = lambda v: v.reshape(1, -1).astype(jnp.float32)   # bias rows stay f32
    bf = lambda w: w.astype(jnp.bfloat16)                   # MXU operands bf16
    return {
        "w1": bf(w1f), "c1": row(c1),
        "w2": bf(w2f), "c2": row(c2),
        "wh": bf(wh), "bh": row(bh),
    }


# ----------------------------------------------------------------------------
# Pure-JAX reference (unfolded f32, follows the PyTorch module literally)
# ----------------------------------------------------------------------------

def reference_forward(x, raw):
    def bn(h, g, be, m, v):
        return (h - m) / jnp.sqrt(v + BN_EPS) * g + be

    h = bn(x, raw["g0"], raw["be0"], raw["m0"], raw["v0"])
    h = _leaky_relu(bn(h @ raw["w1"].T + raw["b1"],
                       raw["g1"], raw["be1"], raw["m1"], raw["v1"]))
    h = _leaky_relu(bn(h @ raw["w2"].T + raw["b2"],
                       raw["g2"], raw["be2"], raw["m2"], raw["v2"]))
    return h @ raw["wa"].T + raw["ba"], h @ raw["wr"].T + raw["br"]


if __name__ == "__main__":
    B, INPUT, H1, H2, N_ATTACK, N_RISK = 8, 16, 32, 32, 10, 5

    key = jax.random.PRNGKey(0)
    k_x, k_p = jax.random.split(key)
    x = jax.random.normal(k_x, (B, INPUT), jnp.float32)

    raw = make_raw_params(k_p, INPUT, H1, H2, N_ATTACK, N_RISK)
    params = fold_params(raw)

    # force_pallas=True so the demo exercises the kernel even at tiny batch.
    out_attack, out_risk = enhanced_multitask_forward(
        x, params, n_attack=N_ATTACK, n_risk=N_RISK, force_pallas=True)
    jax.block_until_ready((out_attack, out_risk))

    ref_attack, ref_risk = reference_forward(x, raw)
    assert out_attack.shape == (B, N_ATTACK) and out_risk.shape == (B, N_RISK)
    # Tolerance relaxed vs f32 reference: kernel uses bf16 MXU operands + bf16 output.
    assert jnp.allclose(out_attack, ref_attack, atol=5e-2, rtol=5e-2), (
        float(jnp.max(jnp.abs(out_attack - ref_attack))))
    assert jnp.allclose(out_risk, ref_risk, atol=5e-2, rtol=5e-2), (
        float(jnp.max(jnp.abs(out_risk - ref_risk))))

    print("KERNEL_OK")
</pallas_src>

<mosaic_0001>
module attributes {stable_mosaic.version = 11 : i64} {
  func.func @mtl_kernel(%arg0: i32, %arg1: memref<8x16xbf16, #tpu.memory_space<vmem>>, %arg2: memref<16x128xbf16, #tpu.memory_space<vmem>>, %arg3: memref<1x128xf32, #tpu.memory_space<vmem>>, %arg4: memref<128x128xbf16, #tpu.memory_space<vmem>>, %arg5: memref<1x128xf32, #tpu.memory_space<vmem>>, %arg6: memref<128x128xbf16, #tpu.memory_space<vmem>>, %arg7: memref<1x128xf32, #tpu.memory_space<vmem>>, %arg8: memref<8x128xbf16, #tpu.memory_space<vmem>>) attributes {dimension_semantics = [#tpu.dimension_semantics<parallel>], iteration_bounds = array<i64: 1>, scalar_prefetch = 0 : i64, scratch_operands = 0 : i64, tpu.core_type = #tpu.core_type<tc>, window_params = [{transform_indices = @transform_0, window_bounds = array<i64: 8, 16>}, {pipeline_mode = #tpu.pipeline_mode<synchronous>, transform_indices = @transform_1, window_bounds = array<i64: 16, 128>}, {pipeline_mode = #tpu.pipeline_mode<synchronous>, transform_indices = @transform_2, window_bounds = array<i64: 1, 128>}, {pipeline_mode = #tpu.pipeline_mode<synchronous>, transform_indices = @transform_3, window_bounds = array<i64: 128, 128>}, {pipeline_mode = #tpu.pipeline_mode<synchronous>, transform_indices = @transform_4, window_bounds = array<i64: 1, 128>}, {pipeline_mode = #tpu.pipeline_mode<synchronous>, transform_indices = @transform_5, window_bounds = array<i64: 128, 128>}, {pipeline_mode = #tpu.pipeline_mode<synchronous>, transform_indices = @transform_6, window_bounds = array<i64: 1, 128>}, {transform_indices = @transform_7, window_bounds = array<i64: 8, 128>}]} {
    %c0 = arith.constant 0 : index
    %c0_0 = arith.constant 0 : index
    %0 = vector.load %arg1[%c0, %c0_0] : memref<8x16xbf16, #tpu.memory_space<vmem>>, vector<8x16xbf16>
    %c0_1 = arith.constant 0 : index
    %c0_2 = arith.constant 0 : index
    %1 = vector.load %arg2[%c0_1, %c0_2] : memref<16x128xbf16, #tpu.memory_space<vmem>>, vector<16x128xbf16>
    %cst = arith.constant dense<0.000000e+00> : vector<8x128xf32>
    %2 = tpu.matmul %0, %1, %cst {dimension_numbers = #tpu.dot_dimension_numbers<[1], [0], [0], [1], [0, 0, 1, 1], [], []>} : vector<8x16xbf16>, vector<16x128xbf16>, vector<8x128xf32> -> vector<8x128xf32>
    %c0_3 = arith.constant 0 : index
    %c0_4 = arith.constant 0 : index
    %3 = vector.load %arg3[%c0_3, %c0_4] : memref<1x128xf32, #tpu.memory_space<vmem>>, vector<1x128xf32>
    %4 = vector.broadcast %3 : vector<1x128xf32> to vector<8x128xf32>
    %5 = arith.addf %2, %4 : vector<8x128xf32>
    %cst_5 = arith.constant 0.000000e+00 : f32
    %6 = vector.broadcast %cst_5 : f32 to vector<8x128xf32>
    %7 = arith.cmpf oge, %5, %6 : vector<8x128xf32>
    %cst_6 = arith.constant 0.00999999977 : f32
    %8 = vector.broadcast %cst_6 : f32 to vector<8x128xf32>
    %9 = arith.mulf %8, %5 : vector<8x128xf32>
    %10 = arith.select %7, %5, %9 : vector<8x128xi1>, vector<8x128xf32>
    %11 = arith.truncf %10 : vector<8x128xf32> to vector<8x128xbf16>
    %c0_7 = arith.constant 0 : index
    %c0_8 = arith.constant 0 : index
    %12 = vector.load %arg4[%c0_7, %c0_8] : memref<128x128xbf16, #tpu.memory_space<vmem>>, vector<128x128xbf16>
    %cst_9 = arith.constant dense<0.000000e+00> : vector<8x128xf32>
    %13 = tpu.matmul %11, %12, %cst_9 {dimension_numbers = #tpu.dot_dimension_numbers<[1], [0], [0], [1], [0, 0, 1, 1], [], []>} : vector<8x128xbf16>, vector<128x128xbf16>, vector<8x128xf32> -> vector<8x128xf32>
    %c0_10 = arith.constant 0 : index
    %c0_11 = arith.constant 0 : index
    %14 = vector.load %arg5[%c0_10, %c0_11] : memref<1x128xf32, #tpu.memory_space<vmem>>, vector<1x128xf32>
    %15 = vector.broadcast %14 : vector<1x128xf32> to vector<8x128xf32>
    %16 = arith.addf %13, %15 : vector<8x128xf32>
    %cst_12 = arith.constant 0.000000e+00 : f32
    %17 = vector.broadcast %cst_12 : f32 to vector<8x128xf32>
    %18 = arith.cmpf oge, %16, %17 : vector<8x128xf32>
    %cst_13 = arith.constant 0.00999999977 : f32
    %19 = vector.broadcast %cst_13 : f32 to vector<8x128xf32>
    %20 = arith.mulf %19, %16 : vector<8x128xf32>
    %21 = arith.select %18, %16, %20 : vector<8x128xi1>, vector<8x128xf32>
    %22 = arith.truncf %21 : vector<8x128xf32> to vector<8x128xbf16>
    %c0_14 = arith.constant 0 : index
    %c0_15 = arith.constant 0 : index
    %23 = vector.load %arg6[%c0_14, %c0_15] : memref<128x128xbf16, #tpu.memory_space<vmem>>, vector<128x128xbf16>
    %cst_16 = arith.constant dense<0.000000e+00> : vector<8x128xf32>
    %24 = tpu.matmul %22, %23, %cst_16 {dimension_numbers = #tpu.dot_dimension_numbers<[1], [0], [0], [1], [0, 0, 1, 1], [], []>} : vector<8x128xbf16>, vector<128x128xbf16>, vector<8x128xf32> -> vector<8x128xf32>
    %c0_17 = arith.constant 0 : index
    %c0_18 = arith.constant 0 : index
    %25 = vector.load %arg7[%c0_17, %c0_18] : memref<1x128xf32, #tpu.memory_space<vmem>>, vector<1x128xf32>
    %26 = vector.broadcast %25 : vector<1x128xf32> to vector<8x128xf32>
    %27 = arith.addf %24, %26 : vector<8x128xf32>
    %28 = arith.truncf %27 : vector<8x128xf32> to vector<8x128xbf16>
    %c0_19 = arith.constant 0 : index
    %c0_20 = arith.constant 0 : index
    %29 = vector.load %arg8[%c0_19, %c0_20] : memref<8x128xbf16, #tpu.memory_space<vmem>>, vector<8x128xbf16>
    tpu.vector_store %arg8[%c0_19, %c0_20], %28 {strides = array<i32>} : memref<8x128xbf16, #tpu.memory_space<vmem>>, vector<8x128xbf16>,
    return
  }
  func.func @transform_0(%arg0: i32) -> (i32, i32) {
    %c0_i32 = arith.constant 0 : i32
    %c0_i32_0 = arith.constant 0 : i32
    return %arg0, %c0_i32 : i32, i32
  }
  func.func @transform_1(%arg0: i32) -> (i32, i32) {
    %c0_i32 = arith.constant 0 : i32
    %c0_i32_0 = arith.constant 0 : i32
    %c0_i32_1 = arith.constant 0 : i32
    return %c0_i32, %c0_i32_0 : i32, i32
  }
  func.func @transform_2(%arg0: i32) -> (i32, i32) {
    %c0_i32 = arith.constant 0 : i32
    %c0_i32_0 = arith.constant 0 : i32
    %c0_i32_1 = arith.constant 0 : i32
    return %c0_i32, %c0_i32_0 : i32, i32
  }
  func.func @transform_3(%arg0: i32) -> (i32, i32) {
    %c0_i32 = arith.constant 0 : i32
    %c0_i32_0 = arith.constant 0 : i32
    %c0_i32_1 = arith.constant 0 : i32
    return %c0_i32, %c0_i32_0 : i32, i32
  }
  func.func @transform_4(%arg0: i32) -> (i32, i32) {
    %c0_i32 = arith.constant 0 : i32
    %c0_i32_0 = arith.constant 0 : i32
    %c0_i32_1 = arith.constant 0 : i32
    return %c0_i32, %c0_i32_0 : i32, i32
  }
  func.func @transform_5(%arg0: i32) -> (i32, i32) {
    %c0_i32 = arith.constant 0 : i32
    %c0_i32_0 = arith.constant 0 : i32
    %c0_i32_1 = arith.constant 0 : i32
    return %c0_i32, %c0_i32_0 : i32, i32
  }
  func.func @transform_6(%arg0: i32) -> (i32, i32) {
    %c0_i32 = arith.constant 0 : i32
    %c0_i32_0 = arith.constant 0 : i32
    %c0_i32_1 = arith.constant 0 : i32
    return %c0_i32, %c0_i32_0 : i32, i32
  }
  func.func @transform_7(%arg0: i32) -> (i32, i32) {
    %c0_i32 = arith.constant 0 : i32
    %c0_i32_0 = arith.constant 0 : i32
    return %arg0, %c0_i32 : i32, i32
  }
}

</mosaic_0001>

<bundles_post_ra>
// kernel: enhanced_multitask_forward.1
= control target key start
LH: loop header
LB: loop body
LE: loop exit
PB: predicated region body
PF: predicated region fallthrough
CT: control target
= control target key end

     0   :  { %12 = vsyncpa [#allocation3], 0  ;;  %s619_s0 = inlined_call_operand.vmem [shape: bf16[8,16], index: 0, kind: input, shape index: {}]   ;;  %s620_s1 = inlined_call_operand.vmem [shape: bf16[16,128], index: 1, kind: input, shape index: {}]   ;;  %s621_s2 = inlined_call_operand.vmem [shape: f32[1,128], index: 2, kind: input, shape index: {}]   ;;  %s622_s3 = inlined_call_operand.hbm [shape: bf16[128,128], index: 3, kind: input, shape index: {}]   ;;  %s623_s4 = inlined_call_operand.vmem [shape: f32[1,128], index: 4, kind: input, shape index: {}]   ;;  %s624_s5 = inlined_call_operand.hbm [shape: bf16[128,128], index: 5, kind: input, shape index: {}]   ;;  %s625_s6 = inlined_call_operand.vmem [shape: f32[1,128], index: 6, kind: input, shape index: {}]   ;;  %s626_s7 = inlined_call_operand.vmem [shape: bf16[8,128], index: 7, kind: output, shape index: {}]  }
   0x1   :  { %13 = vsyncpa [#allocation5], 0  ;;  %s511_s24 = smov [#allocation2]   ;;  %s463_s28 = scalar_lea.hbm %s622_s3, 1024 }
   0x2   :  { %s25_s25 = sshll.u32 %s511_s24, 4  ;;  %p464_p0 = scmp.ne.s32.totalorder %s622_s3, %s463_s28  ;;  %s26_s25 = int_to_ptr.vmem [resolvable:$true] %s25_s25 }
   0x3   :  { %p467_p1 = scmp.lt.u32.totalorder %s463_s28, %s622_s3 }
   0x5   :  { %p469_p2 = pnand %p467_p1, %p464_p0 }
   0x7   :  { %472 = shalt.err (!%p469_p2)
}
   0x8   :  { %s473_s10 = scalar_lea.vmem %s26_s25, 1024  ;;  %p478_p4 = scmp.lt.s32.totalorder %s26_s25, %s26_s25 }
   0x9   :  { %p474_p3 = scmp.ne.s32.totalorder %s26_s25, %s473_s10  ;;  %p479_p5 = scmp.lt.s32.totalorder %s473_s10, %s473_s10 }
   0xb   :  { %p480_p6 = por %p479_p5, %p478_p4 }
   0xd   :  { %p481_p7 = pnand %p480_p6, %p474_p3 }
   0xf   :  { %484 = shalt.err (!%p481_p7)
}
  0x10   :  { %s512_s11 = smov 64   ;;  %s513_s12 = smov 4  }
  0x11   :  { %31 = dma.hbm_to_vmem [thread:$0]  %s622_s3, 1024, %s26_s25, [#allocation3], %s512_s11, %s512_s11, %s513_s12  }
  0x12   :  { %s514_s15 = smov [#allocation4]   ;;  %s485_s19 = scalar_lea.hbm %s624_s5, 1024 }
  0x13   :  { %s39_s16 = sshll.u32 %s514_s15, 4  ;;  %p486_p8 = scmp.ne.s32.totalorder %s624_s5, %s485_s19  ;;  %s40_s16 = int_to_ptr.vmem [resolvable:$true] %s39_s16 }
  0x14   :  { %p489_p9 = scmp.lt.u32.totalorder %s485_s19, %s624_s5 }
  0x16   :  { %p491_p10 = pnand %p489_p9, %p486_p8 }
  0x18   :  { %494 = shalt.err (!%p491_p10)
}
  0x19   :  { %s495_s24 = scalar_lea.vmem %s40_s16, 1024  ;;  %p500_p12 = scmp.lt.s32.totalorder %s40_s16, %s40_s16 }
  0x1a   :  { %p496_p11 = scmp.ne.s32.totalorder %s40_s16, %s495_s24  ;;  %p501_p13 = scmp.lt.s32.totalorder %s495_s24, %s495_s24 }
  0x1c   :  { %p502_p0 = por %p501_p13, %p500_p12 }
  0x1e   :  { %p503_p1 = pnand %p502_p0, %p496_p11 }
  0x20   :  { %506 = shalt.err (!%p503_p1)
}
  0x21   :  { %45 = dma.hbm_to_vmem [thread:$0]  %s624_s5, 1024, %s40_s16, [#allocation5], %s512_s11, %s512_s11, %s513_s12  }
  0x22   :  { %507 = dma.done.wait [#allocation3], 1024  }
  0x23   :  { %508 = vsyncadd [#allocation3], 4294966272 }
  0x24   :  { %509 = dma.done.wait [#allocation5], 1024  }
  0x25   :  { %510 = vsyncadd [#allocation5], 4294966272  ;;  %v515_v0 = vmov 0.0   ;;  %vm516_vm0 = vmmov 0   ;;  %v446_v1 = vld [vmem:[%s620_s1] sm:$0xff]   ;;  %vm71_vm1 = vcmask 130048  }
  0x26   :  { %394 = vmatprep.subr.bf16.mxu0 %v515_v0  ;;  %396 = vmatprep.mubr.msk.bf16.mxu0 %vm516_vm0, %v515_v0  ;;  %v55_v2 = vld [vmem:[%s619_s0] sm:$0xf]  ;;  %v447_v3 = vld [vmem:[#allocation2] sm:$0xff]   ;;  %v448_v4 = vld [vmem:[#allocation2 + $0x8] sm:$0xff]  }
  0x27   :  { %400 = vmatprep.subr.bf16.mxu1 %v515_v0  ;;  %416 = vmatprep.mubr.msk.bf16.mxu1 %vm516_vm0, %v515_v0  ;;  %v449_v5 = vld [vmem:[#allocation2 + $0x10] sm:$0xff]   ;;  %v450_v6 = vld [vmem:[#allocation2 + $0x18] sm:$0xff]   ;;  %v451_v7 = vld [vmem:[#allocation2 + $0x20] sm:$0xff]  }
  0x28   :  { %395 = vmatpush3.bf16.msra.mxu0 %v446_v1  ;;  %401 = vmatpush3.bf16.msra.mxu1 %v447_v3  ;;  %v452_v8 = vld [vmem:[#allocation2 + $0x28] sm:$0xff]   ;;  %v453_v9 = vld [vmem:[#allocation2 + $0x30] sm:$0xff]   ;;  %v454_v10 = vld [vmem:[#allocation2 + $0x38] sm:$0xff]  }
  0x29   :  { %420 = vmatprep.subr.bf16.mxu0 %v515_v0  ;;  %402 = vmatprep.subr.bf16.mxu1 %v515_v0  ;;  %v455_v11 = vld [vmem:[#allocation4] sm:$0xff]   ;;  %v456_v12 = vld [vmem:[#allocation4 + $0x8] sm:$0xff]   ;;  %v457_v13 = vld [vmem:[#allocation4 + $0x10] sm:$0xff]  }
  0x2a   :  { %v458_v14 = vld [vmem:[#allocation4 + $0x18] sm:$0xff]   ;;  %v459_v15 = vld [vmem:[#allocation4 + $0x20] sm:$0xff]   ;;  %v460_v16 = vld [vmem:[#allocation4 + $0x28] sm:$0xff]  }
  0x2b   :  { %397 = vmatmul.mubr.msk.bf16.vlgmr.msra.gmra.mrb[0].mxu0 %vm71_vm1, %v55_v2  ;;  %v353_v17 = vld [vmem:[%s621_s2] ss:$0 sm:$0xff]  ;;  %v462_v27 = vld [vmem:[#allocation4 + $0x38] sm:$0xff]  }
  0x2c   :  { %436 = vmatprep.mubr.msk.bf16.mxu0 %vm516_vm0, %v515_v0  ;;  %403 = vmatpush3.bf16.msra.mxu1 %v448_v4  ;;  %v461_v26 = vld [vmem:[#allocation4 + $0x30] sm:$0xff]  }
  0x2d   :  { %404 = vmatprep.subr.bf16.mxu1 %v515_v0  ;;  %421 = vmatpush3.bf16.msra.mxu0 %v455_v11  ;;  %v356_v28 = vld [vmem:[%s623_s4] ss:$0 sm:$0xff] }
  0x2e   :  { %422 = vmatprep.subr.bf16.mxu0 %v515_v0  ;;  %v365_v37 = vld [vmem:[%s625_s6] ss:$0 sm:$0xff] }
  0x30   :  { %405 = vmatpush3.bf16.msra.mxu1 %v449_v5 }
  0x31   :  { %406 = vmatprep.subr.bf16.mxu1 %v515_v0  ;;  %423 = vmatpush3.bf16.msra.mxu0 %v456_v12 }
  0x32   :  { %424 = vmatprep.subr.bf16.mxu0 %v515_v0 }
  0x34   :  { %407 = vmatpush3.bf16.msra.mxu1 %v450_v6 }
  0x35   :  { %408 = vmatprep.subr.bf16.mxu1 %v515_v0  ;;  %425 = vmatpush3.bf16.msra.mxu0 %v457_v13 }
  0x36   :  { %426 = vmatprep.subr.bf16.mxu0 %v515_v0 }
  0x38   :  { %409 = vmatpush3.bf16.msra.mxu1 %v451_v7 }
  0x39   :  { %410 = vmatprep.subr.bf16.mxu1 %v515_v0  ;;  %427 = vmatpush3.bf16.msra.mxu0 %v458_v14 }
  0x3a   :  { %428 = vmatprep.subr.bf16.mxu0 %v515_v0 }
  0x3c   :  { %411 = vmatpush3.bf16.msra.mxu1 %v452_v8 }
  0x3d   :  { %412 = vmatprep.subr.bf16.mxu1 %v515_v0  ;;  %429 = vmatpush3.bf16.msra.mxu0 %v459_v15 }
  0x3e   :  { %430 = vmatprep.subr.bf16.mxu0 %v515_v0 }
  0x40   :  { %413 = vmatpush3.bf16.msra.mxu1 %v453_v9 }
  0x41   :  { %414 = vmatprep.subr.bf16.mxu1 %v515_v0  ;;  %431 = vmatpush3.bf16.msra.mxu0 %v460_v16 }
  0x42   :  { %432 = vmatprep.subr.bf16.mxu0 %v515_v0 }
  0x44   :  { %415 = vmatpush3.bf16.msra.mxu1 %v454_v10 }
  0x45   :  { %433 = vmatpush3.bf16.msra.mxu0 %v461_v26 }
  0x46   :  { %434 = vmatprep.subr.bf16.mxu0 %v515_v0 }
  0x49   :  { %435 = vmatpush3.bf16.msra.mxu0 %v462_v27 }
  0xfe   :  { %v109_v18 = vpop.f32.mrb[0].mxu0 }
  0xff   :  { %v110_v19 = vadd.f32 %v353_v17, %v109_v18  ;;  %v398_v20 = vpop.f32.mrb[1].mxu0 }
 0x100   :  { %v112_v21 = vpop.f32.mrb[2].mxu0 }
 0x101   :  { %vm115_vm2 = vcmp.ge.f32.partialorder %v110_v19, 0.0  ;;  %v116_v22 = vmul.f32 0.01, %v110_v19  ;;  %v399_v23 = vpop.f32.mrb[3].mxu0 }
 0x103   :  { %v117_v24 = vsel %vm115_vm2, %v110_v19, %v116_v22 }
 0x104   :  { %v118_v25 = vpack.c.bf16 %v117_v24, %v117_v24 }
 0x106   :  { %417 = vmatmul.mubr.bf16.vlgmr.msra.gmra.mrb[0].mxu1 %v118_v25 }
 0x1d9   :  { %v224_v29 = vpop.f32.mrb[0].mxu1 }
 0x1da   :  { %v225_v30 = vadd.f32 %v356_v28, %v224_v29  ;;  %v418_v31 = vpop.f32.mrb[1].mxu1 }
 0x1db   :  { %v227_v32 = vpop.f32.mrb[2].mxu1 }
 0x1dc   :  { %vm230_vm3 = vcmp.ge.f32.partialorder %v225_v30, 0.0  ;;  %v231_v33 = vmul.f32 0.01, %v225_v30  ;;  %v419_v34 = vpop.f32.mrb[3].mxu1 }
 0x1de   :  { %v232_v35 = vsel %vm230_vm3, %v225_v30, %v231_v33 }
 0x1df   :  { %v233_v36 = vpack.c.bf16 %v232_v35, %v232_v35 }
 0x1e1   :  { %437 = vmatmul.mubr.bf16.vlgmr.msra.gmra.mrb[4].mxu0 %v233_v36 }
 0x2b4   :  { %v339_v38 = vpop.f32.mrb[4].mxu0 }
 0x2b5   :  { %v340_v39 = vadd.f32 %v365_v37, %v339_v38  ;;  %v438_v40 = vpop.f32.mrb[5].mxu0 }
 0x2b6   :  { %v342_v41 = vpop.f32.mrb[6].mxu0 }
 0x2b7   :  { %v345_v42 = vpack.c.bf16 %v340_v39, %v340_v39  ;;  %v439_v43 = vpop.f32.mrb[7].mxu0 }
 0x2b9   :  { %346 = vst [vmem:[%s626_s7] sm:$0xf] %v345_v42 }
 0x2ba   :  { %351 = vsyncpa [#allocation3], 1 }
 0x2bb   :  { %352 = vsyncpa [#allocation5], 1 }

</bundles_post_ra>
